<compile_context>
chip_gen: v7x
topology: tpu7x:2x2x1
jax: 0.10.0
libtpu: 0.0.40
codegen_flags: <defaults>
</compile_context>

<pallas_src>
import functools

import numpy as np
import jax
import jax.numpy as jnp
from jax import lax
from jax.experimental import pallas as pl
from jax.experimental.pallas import tpu as pltpu


# ----------------------------------------------------------------------------
# Pallas kernel: the whole forward pass in one program.
# ----------------------------------------------------------------------------
def esn_kernel(x_ref, win_ref, w_ref, out_ref, u_ref, *, alpha, batch, unroll):
    """Single-program ESN recurrence.

    x_ref:   (B, nIn)  input rows                  (VMEM)
    win_ref: (nIn, R)  input weights               (VMEM, resident)
    w_ref:   (R, R)    recurrent weights           (VMEM, resident)
    out_ref: (B, R)    all hidden states (output)  (VMEM, one HBM writeback)
    u_ref:   (B, R)    scratch for U = X @ Win     (VMEM)
    """
    w_dtype = w_ref.dtype
    n_res = w_ref.shape[0]

    # Hoist the input projection off the serial critical path: one MXU call
    # with a real M dimension instead of B separate M=1 matmuls.
    u_ref[...] = jnp.dot(
        x_ref[...].astype(win_ref.dtype), win_ref[...],
        preferred_element_type=jnp.float32)

    w = w_ref[...]

    def step(t, h):
        # h: (1, R) f32, carried in vector registers across iterations.
        u_t = u_ref[pl.ds(t, 1), :]                                 # (1, R) f32
        pre = jnp.dot(h.astype(w_dtype), w,
                      preferred_element_type=jnp.float32) + u_t
        h_new = (1.0 - alpha) * h + alpha * jnp.tanh(pre)
        out_ref[pl.ds(t, 1), :] = h_new.astype(out_ref.dtype)
        return h_new

    h0 = jnp.zeros((1, n_res), jnp.float32)                          # reset()
    lax.fori_loop(0, batch, step, h0, unroll=unroll)


def esn_forward(x, Win, W, *, alpha=0.5):
    """x: (B, nInput) f32 -> (B, nReservoir) f32, sequential recurrence over B.

    Win / W may be float32 (exact torch-module numerics) or bfloat16 (halves
    resident weight VMEM; MXU accumulation stays f32) — the kernel casts the
    activations to the weight dtype for the matmuls.
    """
    B, n_in = x.shape
    n_res = W.shape[0]
    assert Win.shape == (n_in, n_res) and W.shape == (n_res, n_res)

    # Fully unroll small fixed-trip loops (LLO scheduling visibility); cap the
    # unroll factor for long sequences to keep the trace bounded.
    loop_unroll = True if B <= 32 else 8

    # VMEM footprint: x + Win + W + out block + U scratch (f32). Only raise
    # the scoped VMEM limit when the default would force re-tiling of the
    # resident weights (default scoped limit: 16 MiB v5e, 32 MiB v6e/v7x).
    footprint = (x.size * x.dtype.itemsize
                 + Win.size * Win.dtype.itemsize
                 + W.size * W.dtype.itemsize
                 + 2 * B * n_res * 4)
    vmem_limit = None
    if footprint + (2 << 20) > (16 << 20):
        vmem_limit = int(min(footprint + (4 << 20), 100 << 20))

    kernel = functools.partial(
        esn_kernel, alpha=float(alpha), batch=B, unroll=loop_unroll)

    return pl.pallas_call(
        kernel,
        out_shape=jax.ShapeDtypeStruct((B, n_res), jnp.float32),
        grid=(1,),
        in_specs=[
            pl.BlockSpec((B, n_in), lambda i: (0, 0)),       # x (full block)
            pl.BlockSpec((n_in, n_res), lambda i: (0, 0)),   # Win (resident)
            pl.BlockSpec((n_res, n_res), lambda i: (0, 0)),  # W   (resident)
        ],
        out_specs=pl.BlockSpec((B, n_res), lambda i: (0, 0)),   # dense (B, R)
        scratch_shapes=[pltpu.VMEM((B, n_res), jnp.float32)],   # U = X @ Win
        compiler_params=pltpu.CompilerParams(
            dimension_semantics=("arbitrary",),
            vmem_limit_bytes=vmem_limit,
        ),
    )(x, Win, W)


# ----------------------------------------------------------------------------
# Deterministic parameter construction (mirrors singleESN.__init__, seed=1).
# ----------------------------------------------------------------------------
def create_sparse_matrix(n_reservoir, sparsity, rng):
    W = rng.uniform(-1.0, 1.0, (n_reservoir, n_reservoir))
    num_zeros = int(np.ceil(sparsity * n_reservoir))
    for i_col in range(n_reservoir):
        row_indices = rng.permutation(n_reservoir)
        W[row_indices[:num_zeros], i_col] = 0.0
    return W


def make_esn_params(n_input, n_reservoir, *, gamma=0.01, rho=1.0, sparsity=0.9, seed=1):
    rng = np.random.RandomState(seed)
    Win = (gamma * rng.randn(n_input, n_reservoir)).astype(np.float32)
    W = create_sparse_matrix(n_reservoir, sparsity, rng)
    spectral_radius = np.max(np.abs(np.linalg.eigvals(W)))
    W = (rho * W / spectral_radius).astype(np.float32)
    return jnp.asarray(Win), jnp.asarray(W)


# Pure-JAX reference (lax.scan) for a correctness sanity check.
def esn_forward_ref(x, Win, W, *, alpha=0.5):
    def step(h, u):
        v = (1.0 - alpha) * h + alpha * jnp.tanh(h @ W + u @ Win)
        return v, v

    h0 = jnp.zeros((W.shape[0],), jnp.float32)
    _, out = jax.lax.scan(step, h0, x)
    return out


if __name__ == "__main__":
    B, nInput, nReservoir = 8, 16, 128
    alpha = 0.5

    Win, W = make_esn_params(nInput, nReservoir)
    x = jax.random.normal(jax.random.PRNGKey(0), (B, nInput), dtype=jnp.float32)

    # f32 weights: matches the torch module numerics.
    out = jax.block_until_ready(esn_forward(x, Win, W, alpha=alpha))
    ref = jax.block_until_ready(esn_forward_ref(x, Win, W, alpha=alpha))
    np.testing.assert_allclose(np.asarray(out), np.asarray(ref), rtol=1e-2, atol=1e-2)
    assert out.shape == (B, nReservoir) and out.dtype == jnp.float32

    # bf16 weights (perf-review item): halved resident weight VMEM, f32 accum.
    out_bf16 = jax.block_until_ready(
        esn_forward(x, Win.astype(jnp.bfloat16), W.astype(jnp.bfloat16), alpha=alpha))
    np.testing.assert_allclose(np.asarray(out_bf16), np.asarray(ref), rtol=0.1, atol=0.1)

    print("KERNEL_OK")
</pallas_src>

<mosaic_0001>
module attributes {stable_mosaic.version = 11 : i64} {
  func.func @esn_kernel(%arg0: i32, %arg1: memref<8x16xf32, #tpu.memory_space<vmem>>, %arg2: memref<16x128xf32, #tpu.memory_space<vmem>>, %arg3: memref<128x128xf32, #tpu.memory_space<vmem>>, %arg4: memref<8x128xf32, #tpu.memory_space<vmem>>, %arg5: memref<8x128xf32, #tpu.memory_space<vmem>>) attributes {dimension_semantics = [#tpu.dimension_semantics<arbitrary>], iteration_bounds = array<i64: 1>, scalar_prefetch = 0 : i64, scratch_operands = 1 : i64, tpu.core_type = #tpu.core_type<tc>, window_params = [{pipeline_mode = #tpu.pipeline_mode<synchronous>, transform_indices = @transform_0, window_bounds = array<i64: 8, 16>}, {pipeline_mode = #tpu.pipeline_mode<synchronous>, transform_indices = @transform_1, window_bounds = array<i64: 16, 128>}, {pipeline_mode = #tpu.pipeline_mode<synchronous>, transform_indices = @transform_2, window_bounds = array<i64: 128, 128>}, {pipeline_mode = #tpu.pipeline_mode<synchronous>, transform_indices = @transform_3, window_bounds = array<i64: 8, 128>}]} {
    %c0 = arith.constant 0 : index
    %c0_0 = arith.constant 0 : index
    %0 = vector.load %arg1[%c0, %c0_0] : memref<8x16xf32, #tpu.memory_space<vmem>>, vector<8x16xf32>
    %c0_1 = arith.constant 0 : index
    %c0_2 = arith.constant 0 : index
    %1 = vector.load %arg2[%c0_1, %c0_2] : memref<16x128xf32, #tpu.memory_space<vmem>>, vector<16x128xf32>
    %cst = arith.constant dense<0.000000e+00> : vector<8x128xf32>
    %2 = tpu.matmul %0, %1, %cst {dimension_numbers = #tpu.dot_dimension_numbers<[1], [0], [0], [1], [0, 0, 1, 1], [], []>} : vector<8x16xf32>, vector<16x128xf32>, vector<8x128xf32> -> vector<8x128xf32>
    %c0_3 = arith.constant 0 : index
    %c0_4 = arith.constant 0 : index
    %3 = vector.load %arg5[%c0_3, %c0_4] : memref<8x128xf32, #tpu.memory_space<vmem>>, vector<8x128xf32>
    tpu.vector_store %arg5[%c0_3, %c0_4], %2 {strides = array<i32>} : memref<8x128xf32, #tpu.memory_space<vmem>>, vector<8x128xf32>,
    %c0_5 = arith.constant 0 : index
    %c0_6 = arith.constant 0 : index
    %4 = vector.load %arg3[%c0_5, %c0_6] : memref<128x128xf32, #tpu.memory_space<vmem>>, vector<128x128xf32>
    %cst_7 = arith.constant 0.000000e+00 : f32
    %5 = vector.broadcast %cst_7 : f32 to vector<1x128xf32>
    %c0_i32 = arith.constant 0 : i32
    %6 = arith.index_cast %c0_i32 : i32 to index
    %c0_8 = arith.constant 0 : index
    %7 = vector.load %arg5[%6, %c0_8] : memref<8x128xf32, #tpu.memory_space<vmem>>, vector<1x128xf32>
    %cst_9 = arith.constant dense<0.000000e+00> : vector<1x128xf32>
    %8 = tpu.matmul %5, %4, %cst_9 {dimension_numbers = #tpu.dot_dimension_numbers<[1], [0], [0], [1], [0, 0, 1, 1], [], []>} : vector<1x128xf32>, vector<128x128xf32>, vector<1x128xf32> -> vector<1x128xf32>
    %9 = arith.addf %8, %7 : vector<1x128xf32>
    %cst_10 = arith.constant 5.000000e-01 : f32
    %10 = vector.broadcast %cst_10 : f32 to vector<1x128xf32>
    %11 = arith.mulf %10, %5 : vector<1x128xf32>
    %12 = math.tanh %9 : vector<1x128xf32>
    %cst_11 = arith.constant 5.000000e-01 : f32
    %13 = vector.broadcast %cst_11 : f32 to vector<1x128xf32>
    %14 = arith.mulf %13, %12 : vector<1x128xf32>
    %15 = arith.addf %11, %14 : vector<1x128xf32>
    %16 = arith.index_cast %c0_i32 : i32 to index
    %c0_12 = arith.constant 0 : index
    %17 = vector.load %arg4[%16, %c0_12] : memref<8x128xf32, #tpu.memory_space<vmem>>, vector<1x128xf32>
    tpu.vector_store %arg4[%16, %c0_12], %15 {strides = array<i32>} : memref<8x128xf32, #tpu.memory_space<vmem>>, vector<1x128xf32>,
    %c1_i32 = arith.constant 1 : i32
    %18 = arith.index_cast %c1_i32 : i32 to index
    %c0_13 = arith.constant 0 : index
    %19 = vector.load %arg5[%18, %c0_13] : memref<8x128xf32, #tpu.memory_space<vmem>>, vector<1x128xf32>
    %cst_14 = arith.constant dense<0.000000e+00> : vector<1x128xf32>
    %20 = tpu.matmul %15, %4, %cst_14 {dimension_numbers = #tpu.dot_dimension_numbers<[1], [0], [0], [1], [0, 0, 1, 1], [], []>} : vector<1x128xf32>, vector<128x128xf32>, vector<1x128xf32> -> vector<1x128xf32>
    %21 = arith.addf %20, %19 : vector<1x128xf32>
    %cst_15 = arith.constant 5.000000e-01 : f32
    %22 = vector.broadcast %cst_15 : f32 to vector<1x128xf32>
    %23 = arith.mulf %22, %15 : vector<1x128xf32>
    %24 = math.tanh %21 : vector<1x128xf32>
    %cst_16 = arith.constant 5.000000e-01 : f32
    %25 = vector.broadcast %cst_16 : f32 to vector<1x128xf32>
    %26 = arith.mulf %25, %24 : vector<1x128xf32>
    %27 = arith.addf %23, %26 : vector<1x128xf32>
    %28 = arith.index_cast %c1_i32 : i32 to index
    %c0_17 = arith.constant 0 : index
    %29 = vector.load %arg4[%28, %c0_17] : memref<8x128xf32, #tpu.memory_space<vmem>>, vector<1x128xf32>
    tpu.vector_store %arg4[%28, %c0_17], %27 {strides = array<i32>} : memref<8x128xf32, #tpu.memory_space<vmem>>, vector<1x128xf32>,
    %c2_i32 = arith.constant 2 : i32
    %30 = arith.index_cast %c2_i32 : i32 to index
    %c0_18 = arith.constant 0 : index
    %31 = vector.load %arg5[%30, %c0_18] : memref<8x128xf32, #tpu.memory_space<vmem>>, vector<1x128xf32>
    %cst_19 = arith.constant dense<0.000000e+00> : vector<1x128xf32>
    %32 = tpu.matmul %27, %4, %cst_19 {dimension_numbers = #tpu.dot_dimension_numbers<[1], [0], [0], [1], [0, 0, 1, 1], [], []>} : vector<1x128xf32>, vector<128x128xf32>, vector<1x128xf32> -> vector<1x128xf32>
    %33 = arith.addf %32, %31 : vector<1x128xf32>
    %cst_20 = arith.constant 5.000000e-01 : f32
    %34 = vector.broadcast %cst_20 : f32 to vector<1x128xf32>
    %35 = arith.mulf %34, %27 : vector<1x128xf32>
    %36 = math.tanh %33 : vector<1x128xf32>
    %cst_21 = arith.constant 5.000000e-01 : f32
    %37 = vector.broadcast %cst_21 : f32 to vector<1x128xf32>
    %38 = arith.mulf %37, %36 : vector<1x128xf32>
    %39 = arith.addf %35, %38 : vector<1x128xf32>
    %40 = arith.index_cast %c2_i32 : i32 to index
    %c0_22 = arith.constant 0 : index
    %41 = vector.load %arg4[%40, %c0_22] : memref<8x128xf32, #tpu.memory_space<vmem>>, vector<1x128xf32>
    tpu.vector_store %arg4[%40, %c0_22], %39 {strides = array<i32>} : memref<8x128xf32, #tpu.memory_space<vmem>>, vector<1x128xf32>,
    %c3_i32 = arith.constant 3 : i32
    %42 = arith.index_cast %c3_i32 : i32 to index
    %c0_23 = arith.constant 0 : index
    %43 = vector.load %arg5[%42, %c0_23] : memref<8x128xf32, #tpu.memory_space<vmem>>, vector<1x128xf32>
    %cst_24 = arith.constant dense<0.000000e+00> : vector<1x128xf32>
    %44 = tpu.matmul %39, %4, %cst_24 {dimension_numbers = #tpu.dot_dimension_numbers<[1], [0], [0], [1], [0, 0, 1, 1], [], []>} : vector<1x128xf32>, vector<128x128xf32>, vector<1x128xf32> -> vector<1x128xf32>
    %45 = arith.addf %44, %43 : vector<1x128xf32>
    %cst_25 = arith.constant 5.000000e-01 : f32
    %46 = vector.broadcast %cst_25 : f32 to vector<1x128xf32>
    %47 = arith.mulf %46, %39 : vector<1x128xf32>
    %48 = math.tanh %45 : vector<1x128xf32>
    %cst_26 = arith.constant 5.000000e-01 : f32
    %49 = vector.broadcast %cst_26 : f32 to vector<1x128xf32>
    %50 = arith.mulf %49, %48 : vector<1x128xf32>
    %51 = arith.addf %47, %50 : vector<1x128xf32>
    %52 = arith.index_cast %c3_i32 : i32 to index
    %c0_27 = arith.constant 0 : index
    %53 = vector.load %arg4[%52, %c0_27] : memref<8x128xf32, #tpu.memory_space<vmem>>, vector<1x128xf32>
    tpu.vector_store %arg4[%52, %c0_27], %51 {strides = array<i32>} : memref<8x128xf32, #tpu.memory_space<vmem>>, vector<1x128xf32>,
    %c4_i32 = arith.constant 4 : i32
    %54 = arith.index_cast %c4_i32 : i32 to index
    %c0_28 = arith.constant 0 : index
    %55 = vector.load %arg5[%54, %c0_28] : memref<8x128xf32, #tpu.memory_space<vmem>>, vector<1x128xf32>
    %cst_29 = arith.constant dense<0.000000e+00> : vector<1x128xf32>
    %56 = tpu.matmul %51, %4, %cst_29 {dimension_numbers = #tpu.dot_dimension_numbers<[1], [0], [0], [1], [0, 0, 1, 1], [], []>} : vector<1x128xf32>, vector<128x128xf32>, vector<1x128xf32> -> vector<1x128xf32>
    %57 = arith.addf %56, %55 : vector<1x128xf32>
    %cst_30 = arith.constant 5.000000e-01 : f32
    %58 = vector.broadcast %cst_30 : f32 to vector<1x128xf32>
    %59 = arith.mulf %58, %51 : vector<1x128xf32>
    %60 = math.tanh %57 : vector<1x128xf32>
    %cst_31 = arith.constant 5.000000e-01 : f32
    %61 = vector.broadcast %cst_31 : f32 to vector<1x128xf32>
    %62 = arith.mulf %61, %60 : vector<1x128xf32>
    %63 = arith.addf %59, %62 : vector<1x128xf32>
    %64 = arith.index_cast %c4_i32 : i32 to index
    %c0_32 = arith.constant 0 : index
    %65 = vector.load %arg4[%64, %c0_32] : memref<8x128xf32, #tpu.memory_space<vmem>>, vector<1x128xf32>
    tpu.vector_store %arg4[%64, %c0_32], %63 {strides = array<i32>} : memref<8x128xf32, #tpu.memory_space<vmem>>, vector<1x128xf32>,
    %c5_i32 = arith.constant 5 : i32
    %66 = arith.index_cast %c5_i32 : i32 to index
    %c0_33 = arith.constant 0 : index
    %67 = vector.load %arg5[%66, %c0_33] : memref<8x128xf32, #tpu.memory_space<vmem>>, vector<1x128xf32>
    %cst_34 = arith.constant dense<0.000000e+00> : vector<1x128xf32>
    %68 = tpu.matmul %63, %4, %cst_34 {dimension_numbers = #tpu.dot_dimension_numbers<[1], [0], [0], [1], [0, 0, 1, 1], [], []>} : vector<1x128xf32>, vector<128x128xf32>, vector<1x128xf32> -> vector<1x128xf32>
    %69 = arith.addf %68, %67 : vector<1x128xf32>
    %cst_35 = arith.constant 5.000000e-01 : f32
    %70 = vector.broadcast %cst_35 : f32 to vector<1x128xf32>
    %71 = arith.mulf %70, %63 : vector<1x128xf32>
    %72 = math.tanh %69 : vector<1x128xf32>
    %cst_36 = arith.constant 5.000000e-01 : f32
    %73 = vector.broadcast %cst_36 : f32 to vector<1x128xf32>
    %74 = arith.mulf %73, %72 : vector<1x128xf32>
    %75 = arith.addf %71, %74 : vector<1x128xf32>
    %76 = arith.index_cast %c5_i32 : i32 to index
    %c0_37 = arith.constant 0 : index
    %77 = vector.load %arg4[%76, %c0_37] : memref<8x128xf32, #tpu.memory_space<vmem>>, vector<1x128xf32>
    tpu.vector_store %arg4[%76, %c0_37], %75 {strides = array<i32>} : memref<8x128xf32, #tpu.memory_space<vmem>>, vector<1x128xf32>,
    %c6_i32 = arith.constant 6 : i32
    %78 = arith.index_cast %c6_i32 : i32 to index
    %c0_38 = arith.constant 0 : index
    %79 = vector.load %arg5[%78, %c0_38] : memref<8x128xf32, #tpu.memory_space<vmem>>, vector<1x128xf32>
    %cst_39 = arith.constant dense<0.000000e+00> : vector<1x128xf32>
    %80 = tpu.matmul %75, %4, %cst_39 {dimension_numbers = #tpu.dot_dimension_numbers<[1], [0], [0], [1], [0, 0, 1, 1], [], []>} : vector<1x128xf32>, vector<128x128xf32>, vector<1x128xf32> -> vector<1x128xf32>
    %81 = arith.addf %80, %79 : vector<1x128xf32>
    %cst_40 = arith.constant 5.000000e-01 : f32
    %82 = vector.broadcast %cst_40 : f32 to vector<1x128xf32>
    %83 = arith.mulf %82, %75 : vector<1x128xf32>
    %84 = math.tanh %81 : vector<1x128xf32>
    %cst_41 = arith.constant 5.000000e-01 : f32
    %85 = vector.broadcast %cst_41 : f32 to vector<1x128xf32>
    %86 = arith.mulf %85, %84 : vector<1x128xf32>
    %87 = arith.addf %83, %86 : vector<1x128xf32>
    %88 = arith.index_cast %c6_i32 : i32 to index
    %c0_42 = arith.constant 0 : index
    %89 = vector.load %arg4[%88, %c0_42] : memref<8x128xf32, #tpu.memory_space<vmem>>, vector<1x128xf32>
    tpu.vector_store %arg4[%88, %c0_42], %87 {strides = array<i32>} : memref<8x128xf32, #tpu.memory_space<vmem>>, vector<1x128xf32>,
    %c7_i32 = arith.constant 7 : i32
    %90 = arith.index_cast %c7_i32 : i32 to index
    %c0_43 = arith.constant 0 : index
    %91 = vector.load %arg5[%90, %c0_43] : memref<8x128xf32, #tpu.memory_space<vmem>>, vector<1x128xf32>
    %cst_44 = arith.constant dense<0.000000e+00> : vector<1x128xf32>
    %92 = tpu.matmul %87, %4, %cst_44 {dimension_numbers = #tpu.dot_dimension_numbers<[1], [0], [0], [1], [0, 0, 1, 1], [], []>} : vector<1x128xf32>, vector<128x128xf32>, vector<1x128xf32> -> vector<1x128xf32>
    %93 = arith.addf %92, %91 : vector<1x128xf32>
    %cst_45 = arith.constant 5.000000e-01 : f32
    %94 = vector.broadcast %cst_45 : f32 to vector<1x128xf32>
    %95 = arith.mulf %94, %87 : vector<1x128xf32>
    %96 = math.tanh %93 : vector<1x128xf32>
    %cst_46 = arith.constant 5.000000e-01 : f32
    %97 = vector.broadcast %cst_46 : f32 to vector<1x128xf32>
    %98 = arith.mulf %97, %96 : vector<1x128xf32>
    %99 = arith.addf %95, %98 : vector<1x128xf32>
    %100 = arith.index_cast %c7_i32 : i32 to index
    %c0_47 = arith.constant 0 : index
    %101 = vector.load %arg4[%100, %c0_47] : memref<8x128xf32, #tpu.memory_space<vmem>>, vector<1x128xf32>
    tpu.vector_store %arg4[%100, %c0_47], %99 {strides = array<i32>} : memref<8x128xf32, #tpu.memory_space<vmem>>, vector<1x128xf32>,
    %c8_i32 = arith.constant 8 : i32
    return
  }
  func.func @transform_0(%arg0: i32) -> (i32, i32) {
    %c0_i32 = arith.constant 0 : i32
    %c0_i32_0 = arith.constant 0 : i32
    %c0_i32_1 = arith.constant 0 : i32
    return %c0_i32, %c0_i32_0 : i32, i32
  }
  func.func @transform_1(%arg0: i32) -> (i32, i32) {
    %c0_i32 = arith.constant 0 : i32
    %c0_i32_0 = arith.constant 0 : i32
    %c0_i32_1 = arith.constant 0 : i32
    return %c0_i32, %c0_i32_0 : i32, i32
  }
  func.func @transform_2(%arg0: i32) -> (i32, i32) {
    %c0_i32 = arith.constant 0 : i32
    %c0_i32_0 = arith.constant 0 : i32
    %c0_i32_1 = arith.constant 0 : i32
    return %c0_i32, %c0_i32_0 : i32, i32
  }
  func.func @transform_3(%arg0: i32) -> (i32, i32) {
    %c0_i32 = arith.constant 0 : i32
    %c0_i32_0 = arith.constant 0 : i32
    %c0_i32_1 = arith.constant 0 : i32
    return %c0_i32, %c0_i32_0 : i32, i32
  }
}

</mosaic_0001>

<bundles_post_ra>
// kernel: tpu_custom_call.1
= control target key start
LH: loop header
LB: loop body
LE: loop exit
PB: predicated region body
PF: predicated region fallthrough
CT: control target
= control target key end

     0   :  { %8 = vsyncpa [#allocation4], 0  ;;  %s1759_s0 = inlined_call_operand.hbm [shape: f32[8,16], index: 0, kind: input, shape index: {}]   ;;  %s1760_s1 = inlined_call_operand.hbm [shape: f32[16,128], index: 1, kind: input, shape index: {}]   ;;  %s1761_s2 = inlined_call_operand.hbm [shape: f32[128,128], index: 2, kind: input, shape index: {}]   ;;  %s1762_s3 = inlined_call_operand.hbm [shape: f32[8,128], index: 3, kind: output, shape index: {}]  }
   0x1   :  { %9 = vsyncpa [#allocation7], 0 }
   0x2   :  { %10 = vsyncpa [#allocation5], 0  ;;  %s1512_s12 = smov [#allocation6]   ;;  %s1418_s16 = scalar_lea.hbm %s1760_s1, 256 }
   0x3   :  { %s26_s13 = sshll.u32 %s1512_s12, 4  ;;  %p1419_p0 = scmp.ne.s32.totalorder %s1760_s1, %s1418_s16  ;;  %s27_s13 = int_to_ptr.vmem [resolvable:$true] %s26_s13 }
   0x4   :  { %p1422_p1 = scmp.lt.u32.totalorder %s1418_s16, %s1760_s1 }
   0x6   :  { %p1424_p2 = pnand %p1422_p1, %p1419_p0 }
   0x8   :  { %1427 = shalt.err (!%p1424_p2)
}
   0x9   :  { %s1428_s21 = scalar_lea.vmem %s27_s13, 256  ;;  %p1433_p4 = scmp.lt.s32.totalorder %s27_s13, %s27_s13 }
   0xa   :  { %p1429_p3 = scmp.ne.s32.totalorder %s27_s13, %s1428_s21  ;;  %p1434_p5 = scmp.lt.s32.totalorder %s1428_s21, %s1428_s21 }
   0xc   :  { %p1435_p6 = por %p1434_p5, %p1433_p4 }
   0xe   :  { %p1436_p7 = pnand %p1435_p6, %p1429_p3 }
  0x10   :  { %1439 = shalt.err (!%p1436_p7)
}
  0x11   :  { %s1513_s22 = smov 128   ;;  %s1514_s23 = smov 8  }
  0x12   :  { %32 = dma.hbm_to_vmem [thread:$0]  %s1760_s1, 256, %s27_s13, [#allocation7], %s1513_s22, %s1513_s22, %s1514_s23  }
  0x13   :  { %s1515_s26 = smov [#allocation3]   ;;  %s1516_s28 = smov [#allocation8]  }
  0x14   :  { %s17_s27 = sshll.u32 %s1515_s26, 4  ;;  %s38_s29 = sshll.u32 %s1516_s28, 4  ;;  %s18_s27 = int_to_ptr.vmem [resolvable:$true] %s17_s27  ;;  %s39_s29 = int_to_ptr.vmem [resolvable:$true] %s38_s29 }
  0x15   :  { %s1440_s5 = scalar_lea.hbm %s1759_s0, 128 }
  0x16   :  { %p1441_p8 = scmp.ne.s32.totalorder %s1759_s0, %s1440_s5  ;;  %p1444_p9 = scmp.lt.u32.totalorder %s1440_s5, %s1759_s0 }
  0x18   :  { %p1446_p10 = pnand %p1444_p9, %p1441_p8 }
  0x1a   :  { %1449 = shalt.err (!%p1446_p10)
}
  0x1b   :  { %s1450_s1 = scalar_lea.vmem %s18_s27, 128  ;;  %p1455_p12 = scmp.lt.s32.totalorder %s18_s27, %s18_s27 }
  0x1c   :  { %p1451_p11 = scmp.ne.s32.totalorder %s18_s27, %s1450_s1  ;;  %p1456_p13 = scmp.lt.s32.totalorder %s1450_s1, %s1450_s1 }
  0x1e   :  { %p1457_p0 = por %p1456_p13, %p1455_p12 }
  0x20   :  { %p1458_p1 = pnand %p1457_p0, %p1451_p11 }
  0x22   :  { %1461 = shalt.err (!%p1458_p1)
}
  0x23   :  { %20 = dma.hbm_to_vmem [thread:$0]  %s1759_s0, 128, %s18_s27, [#allocation4]  }
  0x24   :  { %s1462_s14 = scalar_lea.hbm %s1761_s2, 2048 }
  0x25   :  { %p1463_p2 = scmp.ne.s32.totalorder %s1761_s2, %s1462_s14  ;;  %p1466_p3 = scmp.lt.u32.totalorder %s1462_s14, %s1761_s2 }
  0x27   :  { %p1468_p4 = pnand %p1466_p3, %p1463_p2 }
  0x29   :  { %1471 = shalt.err (!%p1468_p4)
}
  0x2a   :  { %s1472_s19 = scalar_lea.vmem %s39_s29, 2048  ;;  %p1477_p6 = scmp.lt.s32.totalorder %s39_s29, %s39_s29 }
  0x2b   :  { %p1473_p5 = scmp.ne.s32.totalorder %s39_s29, %s1472_s19  ;;  %p1478_p7 = scmp.lt.s32.totalorder %s1472_s19, %s1472_s19 }
  0x2d   :  { %p1479_p8 = por %p1478_p7, %p1477_p6 }
  0x2f   :  { %p1480_p9 = pnand %p1479_p8, %p1473_p5 }
  0x31   :  { %1483 = shalt.err (!%p1480_p9)
}
  0x32   :  { %44 = dma.hbm_to_vmem [thread:$0]  %s1761_s2, 2048, %s39_s29, [#allocation7], %s1513_s22, %s1513_s22, %s1514_s23  }
  0x33   :  { %1506 = dma.done.wait [#allocation4], 128  }
  0x34   :  { %1507 = vsyncadd [#allocation4], 4294967168 }
  0x35   :  { %1508 = dma.done.wait [#allocation7], 2304  }
  0x36   :  { %1509 = vsyncadd [#allocation7], 4294964992  ;;  %v1517_v0 = vmov 0.0|0.0   ;;  %vm1518_vm0 = vmmov 0   ;;  %v1519_v1 = vmov 0.0   ;;  %v132_v2 = vld [vmem:[#allocation8] sm:$0xff] }
  0x37   :  { %1201 = vmatprep.subr.bf16.mxu1 %v1517_v0  ;;  %1198 = vmatprep.subr.bf16.mxu0 %v1517_v0  ;;  %v133_v3 = vld [vmem:[#allocation8 + $0x8] sm:$0xff]  ;;  %v134_v4 = vld [vmem:[#allocation8 + $0x10] sm:$0xff]  ;;  %v135_v6 = vld [vmem:[#allocation8 + $0x18] sm:$0xff]  ;;  %vm57_vm1 = vcmask 130048   ;;  %s1520_s2 = smov [#allocation9]  }
  0x38   :  { %915 = vmatprep.mubr.msk.f32.mxu0 %vm1518_vm0, %v1519_v1  ;;  %950 = vmatprep.mubr.msk.f32.mxu1 %vm1518_vm0, %v1519_v1  ;;  %v1589_v5 = vpack.c.bf16 %v133_v3, %v132_v2  ;;  %v1592_v7 = vpack.c.bf16 %v135_v6, %v134_v4  ;;  %v55_v8 = vld [vmem:[#allocation6] sm:$0xff]  ;;  %v56_v9 = vld [vmem:[#allocation6 + $0x8] sm:$0xff]  ;;  %v136_v10 = vld [vmem:[#allocation8 + $0x20] sm:$0xff]  ;;  %s761_s21 = sshll.u32 %s1520_s2, 4  ;;  %s762_s21 = int_to_ptr.vmem [resolvable:$true] %s761_s21 }
  0x39   :  { %v137_v11 = vld [vmem:[#allocation8 + $0x28] sm:$0xff]  ;;  %v1199_v12 = vpack.c.bf16 %v56_v9, %v55_v8  ;;  %v138_v15 = vld [vmem:[#allocation8 + $0x30] sm:$0xff]  ;;  %v139_v16 = vld [vmem:[#allocation8 + $0x38] sm:$0xff]  ;;  %s1484_s22 = scalar_lea.vmem %s762_s21, 128  ;;  %p1489_p11 = scmp.lt.s32.totalorder %s762_s21, %s762_s21 }
  0x3a   :  { %1203 = vmatpush3.bf16.msra.mxu1 %v1589_v5  ;;  %v54_v13 = vld [vmem:[#allocation3] sm:$0xff]  ;;  %v1596_v14 = vpack.c.bf16 %v137_v11, %v136_v10  ;;  %v1604_v17 = vpack.c.bf16 %v139_v16, %v138_v15  ;;  %v140_v18 = vld [vmem:[#allocation8 + $0x40] sm:$0xff]  ;;  %v142_v21 = vld [vmem:[#allocation8 + $0x50] sm:$0xff]  ;;  %p1485_p10 = scmp.ne.s32.totalorder %s762_s21, %s1484_s22  ;;  %p1490_p12 = scmp.lt.s32.totalorder %s1484_s22, %s1484_s22 }
  0x3b   :  { %1204 = vmatprep.subr.bf16.mxu1 %v1517_v0  ;;  %1200 = vmatpush3.bf16.msra.mxu0 %v1199_v12  ;;  %v141_v19 = vld [vmem:[#allocation8 + $0x48] sm:$0xff]  ;;  %v143_v22 = vld [vmem:[#allocation8 + $0x58] sm:$0xff]  ;;  %v144_v24 = vld [vmem:[#allocation8 + $0x60] sm:$0xff] }
  0x3c   :  { %1225 = vmatprep.subr.bf16.mxu0 %v1517_v0  ;;  %v1610_v20 = vpack.c.bf16 %v141_v19, %v140_v18  ;;  %v1616_v23 = vpack.c.bf16 %v143_v22, %v142_v21  ;;  %v145_v25 = vld [vmem:[#allocation8 + $0x68] sm:$0xff]  ;;  %v146_v27 = vld [vmem:[#allocation8 + $0x70] sm:$0xff]  ;;  %v147_v28 = vld [vmem:[#allocation8 + $0x78] sm:$0xff]  ;;  %p1491_p13 = por %p1490_p12, %p1489_p11 }
  0x3d   :  { %v1622_v26 = vpack.c.bf16 %v145_v25, %v144_v24  ;;  %v1628_v29 = vpack.c.bf16 %v147_v28, %v146_v27 }
  0x3e   :  { %1206 = vmatpush3.bf16.msra.mxu1 %v1592_v7  ;;  %916 = vmatmul.mubr.msk.f32.vlgmr.msra.gmra.mrb[0].mxu0 %vm57_vm1, %v54_v13  ;;  %p1492_p0 = pnand %p1491_p13, %p1485_p10 }
  0x3f   :  { %1207 = vmatprep.subr.bf16.mxu1 %v1517_v0  ;;  %1227 = vmatpush3.bf16.msra.mxu0 %v1589_v5 }
  0x40   :  { %985 = vmatprep.mubr.msk.f32.mxu0 %vm1518_vm0, %v1519_v1  ;;  %1228 = vmatprep.subr.bf16.mxu0 %v1517_v0 }
  0x42   :  { %1209 = vmatpush3.bf16.msra.mxu1 %v1596_v14 }
  0x43   :  { %1210 = vmatprep.subr.bf16.mxu1 %v1517_v0  ;;  %1230 = vmatpush3.bf16.msra.mxu0 %v1592_v7 }
  0x44   :  { %1231 = vmatprep.subr.bf16.mxu0 %v1517_v0 }
  0x46   :  { %1212 = vmatpush3.bf16.msra.mxu1 %v1604_v17 }
  0x47   :  { %1213 = vmatprep.subr.bf16.mxu1 %v1517_v0  ;;  %1233 = vmatpush3.bf16.msra.mxu0 %v1596_v14 }
  0x48   :  { %1234 = vmatprep.subr.bf16.mxu0 %v1517_v0 }
  0x4a   :  { %1215 = vmatpush3.bf16.msra.mxu1 %v1610_v20 }
  0x4b   :  { %1216 = vmatprep.subr.bf16.mxu1 %v1517_v0  ;;  %1236 = vmatpush3.bf16.msra.mxu0 %v1604_v17 }
  0x4c   :  { %1237 = vmatprep.subr.bf16.mxu0 %v1517_v0 }
  0x4e   :  { %1218 = vmatpush3.bf16.msra.mxu1 %v1616_v23 }
  0x4f   :  { %1219 = vmatprep.subr.bf16.mxu1 %v1517_v0  ;;  %1239 = vmatpush3.bf16.msra.mxu0 %v1610_v20 }
  0x50   :  { %1240 = vmatprep.subr.bf16.mxu0 %v1517_v0 }
  0x52   :  { %1221 = vmatpush3.bf16.msra.mxu1 %v1622_v26 }
  0x53   :  { %1222 = vmatprep.subr.bf16.mxu1 %v1517_v0  ;;  %1242 = vmatpush3.bf16.msra.mxu0 %v1616_v23 }
  0x54   :  { %1243 = vmatprep.subr.bf16.mxu0 %v1517_v0 }
  0x56   :  { %1224 = vmatpush3.bf16.msra.mxu1 %v1628_v29 }
  0x57   :  { %1249 = vmatprep.subr.bf16.mxu1 %v1517_v0  ;;  %1245 = vmatpush3.bf16.msra.mxu0 %v1622_v26 }
  0x58   :  { %1246 = vmatprep.subr.bf16.mxu0 %v1517_v0 }
  0x59   :  { %951 = vmatmul.mubr.f32.vlgmr.msra.gmra.mrb[0].mxu1 %v1519_v1 }
  0x5a   :  { %1251 = vmatpush3.bf16.msra.mxu1 %v1589_v5  ;;  %1020 = vmatprep.mubr.msk.f32.mxu1 %vm1518_vm0, %v1519_v1 }
  0x5b   :  { %1252 = vmatprep.subr.bf16.mxu1 %v1517_v0  ;;  %1248 = vmatpush3.bf16.msra.mxu0 %v1628_v29 }
  0x5c   :  { %1273 = vmatprep.subr.bf16.mxu0 %v1517_v0 }
  0x5e   :  { %1254 = vmatpush3.bf16.msra.mxu1 %v1592_v7 }
  0x5f   :  { %1255 = vmatprep.subr.bf16.mxu1 %v1517_v0 }
  0x62   :  { %1257 = vmatpush3.bf16.msra.mxu1 %v1596_v14 }
  0x63   :  { %1258 = vmatprep.subr.bf16.mxu1 %v1517_v0 }
  0x66   :  { %1260 = vmatpush3.bf16.msra.mxu1 %v1604_v17 }
  0x67   :  { %1261 = vmatprep.subr.bf16.mxu1 %v1517_v0 }
  0x6a   :  { %1263 = vmatpush3.bf16.msra.mxu1 %v1610_v20 }
  0x6b   :  { %1264 = vmatprep.subr.bf16.mxu1 %v1517_v0 }
  0x6e   :  { %1266 = vmatpush3.bf16.msra.mxu1 %v1616_v23 }
  0x6f   :  { %1267 = vmatprep.subr.bf16.mxu1 %v1517_v0 }
  0x72   :  { %1269 = vmatpush3.bf16.msra.mxu1 %v1622_v26 }
  0x73   :  { %1270 = vmatprep.subr.bf16.mxu1 %v1517_v0 }
  0x76   :  { %1272 = vmatpush3.bf16.msra.mxu1 %v1628_v29 }
  0x77   :  { %1297 = vmatprep.subr.bf16.mxu1 %v1517_v0 }
 0x111   :  { %v127_v30 = vpop.f32.mrb[0].mxu0 }
 0x112   :  { %131 = vst [vmem:[#allocation2] sm:$0xff] %v127_v30  ;;  %v917_v31 = vpop.f32.mrb[1].mxu0 }
 0x119   :  { %v148_v32 = vld [vmem:[#allocation2] sm:$0x1]  ;;  %v223_v38 = vld [vmem:[#allocation2 + $0x1] sm:$0x1]  ;;  %v299_v46 = vld [vmem:[#allocation2 + $0x2] sm:$0x1] }
 0x11a   :  { %v375_v54 = vld [vmem:[#allocation2 + $0x3] sm:$0x1]  ;;  %v451_v62 = vld [vmem:[#allocation2 + $0x4] sm:$0x1]  ;;  %v603_v15 = vld [vmem:[#allocation2 + $0x6] sm:$0x1] }
 0x11b   :  { %v679_v22 = vld [vmem:[#allocation2 + $0x7] sm:$0x1] }
 0x12c   :  { %v215_v33 = vpop.f32.mrb[0].mxu1 }
 0x12d   :  { %v216_v34 = vadd.f32 %v215_v33, %v148_v32  ;;  %v952_v35 = vpop.f32.mrb[1].mxu1 }
 0x12f   :  { %1402 = vtanh.f32 %v216_v34 }
 0x139   :  { %v1403_v36 = vpop.eup %1402 }
 0x13a   :  { %v220_v37 = vmul.f32 0.5, %v1403_v36 }
 0x13c   :  { %222 = vst [vmem:[#allocation9] sm:$0x1] %v220_v37  ;;  %986 = vmatmul.mubr.f32.vlgmr.msra.gmra.mrb[2].mxu0 %v220_v37  ;;  %v294_v43 = vmul.f32 0.5, %v220_v37 }
 0x13d   :  { %1275 = vmatpush3.bf16.msra.mxu0 %v1589_v5  ;;  %1055 = vmatprep.mubr.msk.f32.mxu0 %vm1518_vm0, %v1519_v1 }
 0x13e   :  { %1276 = vmatprep.subr.bf16.mxu0 %v1517_v0 }
 0x141   :  { %1278 = vmatpush3.bf16.msra.mxu0 %v1592_v7 }
 0x142   :  { %1279 = vmatprep.subr.bf16.mxu0 %v1517_v0 }
 0x145   :  { %1281 = vmatpush3.bf16.msra.mxu0 %v1596_v14 }
 0x146   :  { %1282 = vmatprep.subr.bf16.mxu0 %v1517_v0 }
 0x149   :  { %1284 = vmatpush3.bf16.msra.mxu0 %v1604_v17 }
 0x14a   :  { %1285 = vmatprep.subr.bf16.mxu0 %v1517_v0 }
 0x14d   :  { %1287 = vmatpush3.bf16.msra.mxu0 %v1610_v20 }
 0x14e   :  { %1288 = vmatprep.subr.bf16.mxu0 %v1517_v0 }
 0x151   :  { %1290 = vmatpush3.bf16.msra.mxu0 %v1616_v23 }
 0x152   :  { %1291 = vmatprep.subr.bf16.mxu0 %v1517_v0 }
 0x155   :  { %1293 = vmatpush3.bf16.msra.mxu0 %v1622_v26 }
 0x156   :  { %1294 = vmatprep.subr.bf16.mxu0 %v1517_v0 }
 0x159   :  { %1296 = vmatpush3.bf16.msra.mxu0 %v1628_v29 }
 0x15a   :  { %1321 = vmatprep.subr.bf16.mxu0 %v1517_v0 }
 0x20f   :  { %v290_v39 = vpop.f32.mrb[2].mxu0 }
 0x210   :  { %v291_v40 = vadd.f32 %v290_v39, %v223_v38  ;;  %v987_v41 = vpop.f32.mrb[3].mxu0 }
 0x212   :  { %1404 = vtanh.f32 %v291_v40 }
 0x21c   :  { %v1405_v42 = vpop.eup %1404 }
 0x21d   :  { %v296_v44 = vmul.f32 0.5, %v1405_v42 }
 0x21f   :  { %v297_v45 = vadd.f32 %v296_v44, %v294_v43 }
 0x221   :  { %298 = vst [vmem:[#allocation9 + $0x1] sm:$0x1] %v297_v45  ;;  %1021 = vmatmul.mubr.f32.vlgmr.msra.gmra.mrb[2].mxu1 %v297_v45  ;;  %v370_v51 = vmul.f32 0.5, %v297_v45 }
 0x222   :  { %1299 = vmatpush3.bf16.msra.mxu1 %v1589_v5  ;;  %1090 = vmatprep.mubr.msk.f32.mxu1 %vm1518_vm0, %v1519_v1 }
 0x223   :  { %1300 = vmatprep.subr.bf16.mxu1 %v1517_v0 }
 0x226   :  { %1302 = vmatpush3.bf16.msra.mxu1 %v1592_v7 }
 0x227   :  { %1303 = vmatprep.subr.bf16.mxu1 %v1517_v0 }
 0x22a   :  { %1305 = vmatpush3.bf16.msra.mxu1 %v1596_v14 }
 0x22b   :  { %1306 = vmatprep.subr.bf16.mxu1 %v1517_v0 }
 0x22e   :  { %1308 = vmatpush3.bf16.msra.mxu1 %v1604_v17 }
 0x22f   :  { %1309 = vmatprep.subr.bf16.mxu1 %v1517_v0 }
 0x232   :  { %1311 = vmatpush3.bf16.msra.mxu1 %v1610_v20 }
 0x233   :  { %1312 = vmatprep.subr.bf16.mxu1 %v1517_v0 }
 0x236   :  { %1314 = vmatpush3.bf16.msra.mxu1 %v1616_v23 }
 0x237   :  { %1315 = vmatprep.subr.bf16.mxu1 %v1517_v0 }
 0x23a   :  { %1317 = vmatpush3.bf16.msra.mxu1 %v1622_v26 }
 0x23b   :  { %1318 = vmatprep.subr.bf16.mxu1 %v1517_v0 }
 0x23e   :  { %1320 = vmatpush3.bf16.msra.mxu1 %v1628_v29 }
 0x23f   :  { %1345 = vmatprep.subr.bf16.mxu1 %v1517_v0 }
 0x2f4   :  { %v366_v47 = vpop.f32.mrb[2].mxu1 }
 0x2f5   :  { %v367_v48 = vadd.f32 %v366_v47, %v299_v46  ;;  %v1022_v49 = vpop.f32.mrb[3].mxu1 }
 0x2f7   :  { %1406 = vtanh.f32 %v367_v48 }
 0x301   :  { %v1407_v50 = vpop.eup %1406 }
 0x302   :  { %v372_v52 = vmul.f32 0.5, %v1407_v50 }
 0x304   :  { %v373_v53 = vadd.f32 %v372_v52, %v370_v51 }
 0x306   :  { %374 = vst [vmem:[#allocation9 + $0x2] sm:$0x1] %v373_v53  ;;  %1056 = vmatmul.mubr.f32.vlgmr.msra.gmra.mrb[4].mxu0 %v373_v53  ;;  %v446_v59 = vmul.f32 0.5, %v373_v53 }
 0x307   :  { %1323 = vmatpush3.bf16.msra.mxu0 %v1589_v5  ;;  %1125 = vmatprep.mubr.msk.f32.mxu0 %vm1518_vm0, %v1519_v1 }
 0x308   :  { %1324 = vmatprep.subr.bf16.mxu0 %v1517_v0 }
 0x30b   :  { %1326 = vmatpush3.bf16.msra.mxu0 %v1592_v7 }
 0x30c   :  { %1327 = vmatprep.subr.bf16.mxu0 %v1517_v0 }
 0x30f   :  { %1329 = vmatpush3.bf16.msra.mxu0 %v1596_v14 }
 0x310   :  { %1330 = vmatprep.subr.bf16.mxu0 %v1517_v0 }
 0x313   :  { %1332 = vmatpush3.bf16.msra.mxu0 %v1604_v17 }
 0x314   :  { %1333 = vmatprep.subr.bf16.mxu0 %v1517_v0 }
 0x317   :  { %1335 = vmatpush3.bf16.msra.mxu0 %v1610_v20 }
 0x318   :  { %1336 = vmatprep.subr.bf16.mxu0 %v1517_v0 }
 0x31b   :  { %1338 = vmatpush3.bf16.msra.mxu0 %v1616_v23 }
 0x31c   :  { %1339 = vmatprep.subr.bf16.mxu0 %v1517_v0 }
 0x31f   :  { %1341 = vmatpush3.bf16.msra.mxu0 %v1622_v26 }
 0x320   :  { %1342 = vmatprep.subr.bf16.mxu0 %v1517_v0 }
 0x323   :  { %1344 = vmatpush3.bf16.msra.mxu0 %v1628_v29 }
 0x324   :  { %1369 = vmatprep.subr.bf16.mxu0 %v1517_v0 }
 0x3d9   :  { %v442_v55 = vpop.f32.mrb[4].mxu0 }
 0x3da   :  { %v443_v56 = vadd.f32 %v442_v55, %v375_v54  ;;  %v1057_v57 = vpop.f32.mrb[5].mxu0 }
 0x3dc   :  { %1408 = vtanh.f32 %v443_v56 }
 0x3e6   :  { %v1409_v58 = vpop.eup %1408 }
 0x3e7   :  { %v448_v60 = vmul.f32 0.5, %v1409_v58 }
 0x3e9   :  { %v449_v61 = vadd.f32 %v448_v60, %v446_v59 }
 0x3eb   :  { %450 = vst [vmem:[#allocation9 + $0x3] sm:$0x1] %v449_v61  ;;  %1091 = vmatmul.mubr.f32.vlgmr.msra.gmra.mrb[4].mxu1 %v449_v61  ;;  %v522_v6 = vmul.f32 0.5, %v449_v61 }
 0x3ec   :  { %1347 = vmatpush3.bf16.msra.mxu1 %v1589_v5  ;;  %1160 = vmatprep.mubr.msk.f32.mxu1 %vm1518_vm0, %v1519_v1 }
 0x3ed   :  { %1348 = vmatprep.subr.bf16.mxu1 %v1517_v0 }
 0x3f0   :  { %1350 = vmatpush3.bf16.msra.mxu1 %v1592_v7 }
 0x3f1   :  { %1351 = vmatprep.subr.bf16.mxu1 %v1517_v0 }
 0x3f4   :  { %1353 = vmatpush3.bf16.msra.mxu1 %v1596_v14 }
 0x3f5   :  { %1354 = vmatprep.subr.bf16.mxu1 %v1517_v0 }
 0x3f8   :  { %1356 = vmatpush3.bf16.msra.mxu1 %v1604_v17 }
 0x3f9   :  { %1357 = vmatprep.subr.bf16.mxu1 %v1517_v0 }
 0x3fc   :  { %1359 = vmatpush3.bf16.msra.mxu1 %v1610_v20 }
 0x3fd   :  { %1360 = vmatprep.subr.bf16.mxu1 %v1517_v0 }
 0x400   :  { %1362 = vmatpush3.bf16.msra.mxu1 %v1616_v23 }
 0x401   :  { %1363 = vmatprep.subr.bf16.mxu1 %v1517_v0 }
 0x404   :  { %1365 = vmatpush3.bf16.msra.mxu1 %v1622_v26 }
 0x405   :  { %1366 = vmatprep.subr.bf16.mxu1 %v1517_v0 }
 0x408   :  { %1368 = vmatpush3.bf16.msra.mxu1 %v1628_v29 }
 0x4be   :  { %v518_v63 = vpop.f32.mrb[4].mxu1 }
 0x4bf   :  { %v519_v2 = vadd.f32 %v518_v63, %v451_v62  ;;  %v1092_v3 = vpop.f32.mrb[5].mxu1 }
 0x4c1   :  { %1410 = vtanh.f32 %v519_v2 }
 0x4cb   :  { %v1411_v4 = vpop.eup %1410 }
 0x4cc   :  { %v524_v8 = vmul.f32 0.5, %v1411_v4 }
 0x4ce   :  { %v525_v9 = vadd.f32 %v524_v8, %v522_v6 }
 0x4d0   :  { %526 = vst [vmem:[#allocation9 + $0x4] sm:$0x1] %v525_v9  ;;  %1126 = vmatmul.mubr.f32.vlgmr.msra.gmra.mrb[6].mxu0 %v525_v9  ;;  %v598_v12 = vmul.f32 0.5, %v525_v9 }
 0x4d1   :  { %1371 = vmatpush3.bf16.msra.mxu0 %v1589_v5  ;;  %1195 = vmatprep.mubr.msk.f32.mxu0 %vm1518_vm0, %v1519_v1  ;;  %v527_v1 = vld [vmem:[#allocation2 + $0x5] sm:$0x1] }
 0x4d2   :  { %1372 = vmatprep.subr.bf16.mxu0 %v1517_v0 }
 0x4d5   :  { %1374 = vmatpush3.bf16.msra.mxu0 %v1592_v7 }
 0x4d6   :  { %1375 = vmatprep.subr.bf16.mxu0 %v1517_v0 }
 0x4d9   :  { %1377 = vmatpush3.bf16.msra.mxu0 %v1596_v14 }
 0x4da   :  { %1378 = vmatprep.subr.bf16.mxu0 %v1517_v0 }
 0x4dd   :  { %1380 = vmatpush3.bf16.msra.mxu0 %v1604_v17 }
 0x4de   :  { %1381 = vmatprep.subr.bf16.mxu0 %v1517_v0 }
 0x4e1   :  { %1383 = vmatpush3.bf16.msra.mxu0 %v1610_v20 }
 0x4e2   :  { %1384 = vmatprep.subr.bf16.mxu0 %v1517_v0 }
 0x4e5   :  { %1386 = vmatpush3.bf16.msra.mxu0 %v1616_v23 }
 0x4e6   :  { %1387 = vmatprep.subr.bf16.mxu0 %v1517_v0 }
 0x4e9   :  { %1389 = vmatpush3.bf16.msra.mxu0 %v1622_v26 }
 0x4ea   :  { %1390 = vmatprep.subr.bf16.mxu0 %v1517_v0 }
 0x4ed   :  { %1392 = vmatpush3.bf16.msra.mxu0 %v1628_v29 }
 0x5a3   :  { %v594_v5 = vpop.f32.mrb[6].mxu0 }
 0x5a4   :  { %v595_v7 = vadd.f32 %v594_v5, %v527_v1  ;;  %v1127_v10 = vpop.f32.mrb[7].mxu0 }
 0x5a6   :  { %1412 = vtanh.f32 %v595_v7 }
 0x5b0   :  { %v1413_v11 = vpop.eup %1412 }
 0x5b1   :  { %v600_v13 = vmul.f32 0.5, %v1413_v11 }
 0x5b3   :  { %v601_v14 = vadd.f32 %v600_v13, %v598_v12 }
 0x5b5   :  { %602 = vst [vmem:[#allocation9 + $0x5] sm:$0x1] %v601_v14  ;;  %1161 = vmatmul.mubr.f32.vlgmr.msra.gmra.mrb[6].mxu1 %v601_v14  ;;  %v674_v0 = vmul.f32 0.5, %v601_v14 }
 0x688   :  { %v670_v16 = vpop.f32.mrb[6].mxu1 }
 0x689   :  { %v671_v17 = vadd.f32 %v670_v16, %v603_v15  ;;  %v1162_v18 = vpop.f32.mrb[7].mxu1 }
 0x68b   :  { %1414 = vtanh.f32 %v671_v17 }
 0x695   :  { %v1415_v19 = vpop.eup %1414 }
 0x696   :  { %v676_v20 = vmul.f32 0.5, %v1415_v19 }
 0x698   :  { %v677_v21 = vadd.f32 %v676_v20, %v674_v0 }
 0x69a   :  { %678 = vst [vmem:[#allocation9 + $0x6] sm:$0x1] %v677_v21  ;;  %1196 = vmatmul.mubr.f32.vlgmr.msra.gmra.mrb[8].mxu0 %v677_v21  ;;  %v750_v27 = vmul.f32 0.5, %v677_v21 }
 0x76d   :  { %v746_v23 = vpop.f32.mrb[8].mxu0 }
 0x76e   :  { %v747_v24 = vadd.f32 %v746_v23, %v679_v22  ;;  %v1197_v25 = vpop.f32.mrb[9].mxu0 }
 0x770   :  { %1416 = vtanh.f32 %v747_v24 }
 0x77a   :  { %v1417_v26 = vpop.eup %1416 }
 0x77b   :  { %v752_v28 = vmul.f32 0.5, %v1417_v26 }
 0x77d   :  { %v753_v29 = vadd.f32 %v752_v28, %v750_v27 }
 0x77f   :  { %754 = vst [vmem:[#allocation9 + $0x7] sm:$0x1] %v753_v29 }
 0x780   :  { %1495 = shalt.err (!%p1492_p0)
}
 0x781   :  { %s1496_s25 = scalar_lea.hbm %s1762_s3, 128 }
 0x782   :  { %p1497_p1 = scmp.ne.s32.totalorder %s1762_s3, %s1496_s25  ;;  %p1500_p2 = scmp.lt.u32.totalorder %s1496_s25, %s1762_s3 }
 0x784   :  { %p1502_p3 = pnand %p1500_p2, %p1497_p1 }
 0x786   :  { %1505 = shalt.err (!%p1502_p3)
}
 0x787   :  { %764 = dma.vmem_to_hbm [thread:$0]  %s762_s21, 128, %s1762_s3, [#allocation5]  }
 0x788   :  { %1510 = dma.done.wait [#allocation5], 128  }
 0x789   :  { %1511 = vsyncadd [#allocation5], 4294967168 }
 0x78a   :  { %768 = vsyncpa [#allocation4], 1 }
 0x78b   :  { %769 = vsyncpa [#allocation7], 1 }
 0x78c   :  { %770 = vsyncpa [#allocation5], 1 }

</bundles_post_ra>
